<compile_context>
chip_gen: v5e
topology: v5e:2x2
jax: 0.10.0
libtpu: 0.0.40
codegen_flags: <defaults>
</compile_context>

<pallas_src>
import math

import jax
import jax.numpy as jnp
from jax.experimental import pallas as pl
from jax.experimental.pallas import tpu as pltpu


def _linear_kernel_single(x_ref, w_ref, b_ref, o_ref):
    # Whole K reduction in one MXU call; bias added once; no scratch.
    acc = jnp.dot(x_ref[...], w_ref[...], preferred_element_type=jnp.float32)
    o_ref[...] = (acc + b_ref[...].astype(jnp.float32)).astype(o_ref.dtype)


def _linear_kernel_acc(x_ref, w_ref, b_ref, o_ref, acc_ref):
    # K is the last ("arbitrary") grid axis; output block resident across it.
    @pl.when(pl.program_id(2) == 0)
    def _():
        # Fold bias into the accumulator init (saves an epilogue add).
        acc_ref[...] = jnp.broadcast_to(
            b_ref[...].astype(jnp.float32), acc_ref.shape
        )

    acc_ref[...] += jnp.dot(
        x_ref[...], w_ref[...], preferred_element_type=jnp.float32
    )

    @pl.when(pl.program_id(2) == pl.num_programs(2) - 1)
    def _():
        o_ref[...] = acc_ref[...].astype(o_ref.dtype)


def _round_up(v, m):
    return ((v + m - 1) // m) * m


def linear(x, w, b, *, tm=None, tn=None, tk=None):
    """y = x @ w + b, matching the PyTorch module's forward."""
    M, K = x.shape
    Kw, N = w.shape
    assert K == Kw and b.shape == (N,)
    out_dtype = x.dtype

    # Minimum TPU-aligned extents (sublane 8, lane 128).
    m_min = _round_up(M, 8)
    n_min = _round_up(N, 128)
    k_min = _round_up(K, 128)

    user_tm = tm
    # Large default tiles, clamped to the (aligned) problem size.
    tm = tm if tm is not None else min(512, m_min)
    tn = tn if tn is not None else min(512, n_min)
    tk = tk if tk is not None else min(1024, k_min)
    tm, tn, tk = _round_up(tm, 8), _round_up(tn, 128), _round_up(tk, 128)

    # Keep >=2 parallel blocks when possible so v7x's second TensorCore
    # gets work (megacore sharding of the "parallel" axes).
    if (user_tm is None and pl.cdiv(m_min, tm) == 1
            and pl.cdiv(n_min, tn) == 1 and m_min >= 16):
        tm = _round_up(pl.cdiv(m_min, 2), 8)

    # Pad operands to tile multiples (zeros are exact for matmul + bias).
    Mp, Np, Kp = _round_up(M, tm), _round_up(N, tn), _round_up(K, tk)
    xp = x if (Mp == M and Kp == K) else jnp.pad(x, ((0, Mp - M), (0, Kp - K)))
    wp = w if (Kp == K and Np == N) else jnp.pad(w, ((0, Kp - K), (0, Np - N)))
    bp = b if Np == N else jnp.pad(b, (0, Np - N))
    b2d = bp.reshape(1, Np)

    gm, gn, gk = Mp // tm, Np // tn, Kp // tk

    # Scoped-VMEM budget for the double-buffered tiles (+ f32 accumulator).
    out_isz = jnp.dtype(out_dtype).itemsize
    in_isz = jnp.dtype(x.dtype).itemsize
    footprint = (
        2 * (tm * tk + tk * tn + tn) * in_isz  # double-buffered inputs
        + 2 * tm * tn * out_isz                # double-buffered output
        + tm * tn * 4                          # f32 accumulator scratch
    )
    vmem_limit = int(min(max(2 * footprint, 32 << 20), 48 << 20))

    cost = pl.CostEstimate(
        flops=2 * M * N * K,
        bytes_accessed=in_isz * (M * K + K * N + N) + out_isz * M * N,
        transcendentals=0,
    )

    if gk == 1:
        # K fits in one tile: no reduction axis, no accumulator scratch.
        grid_spec = pltpu.PrefetchScalarGridSpec(
            num_scalar_prefetch=0,
            grid=(gm, gn),
            in_specs=[
                pl.BlockSpec((tm, Kp), lambda i, j: (i, 0)),
                pl.BlockSpec((Kp, tn), lambda i, j: (0, j)),
                pl.BlockSpec((1, tn), lambda i, j: (0, j)),
            ],
            out_specs=pl.BlockSpec((tm, tn), lambda i, j: (i, j)),
        )
        kernel = _linear_kernel_single
        dim_sem = ("parallel", "parallel")
    else:
        grid_spec = pltpu.PrefetchScalarGridSpec(
            num_scalar_prefetch=0,
            grid=(gm, gn, gk),
            in_specs=[
                pl.BlockSpec((tm, tk), lambda i, j, k: (i, k)),
                pl.BlockSpec((tk, tn), lambda i, j, k: (k, j)),
                pl.BlockSpec((1, tn), lambda i, j, k: (0, j)),
            ],
            out_specs=pl.BlockSpec((tm, tn), lambda i, j, k: (i, j)),
            scratch_shapes=[pltpu.VMEM((tm, tn), jnp.float32)],
        )
        kernel = _linear_kernel_acc
        dim_sem = ("parallel", "parallel", "arbitrary")

    out_padded = pl.pallas_call(
        kernel,
        out_shape=jax.ShapeDtypeStruct((Mp, Np), out_dtype),
        grid_spec=grid_spec,
        compiler_params=pltpu.CompilerParams(
            dimension_semantics=dim_sem,
            vmem_limit_bytes=vmem_limit,
        ),
        cost_estimate=cost,
    )(xp, wp, b2d)

    if Mp == M and Np == N:
        return out_padded
    return out_padded[:M, :N]


if __name__ == "__main__":
    # Small demo shapes consistent with the module:
    #   Linear(in_features=96, out_features=80), batch M=64.
    # Deliberately non-multiples of (8,128) on K/N to exercise the padding path.
    in_features, out_features = 96, 80
    M = 64

    key = jax.random.PRNGKey(0)
    kx, kw, kb = jax.random.split(key, 3)

    # Parameter init mirroring reset_parameters():
    # uniform(-stdv, stdv) with stdv = 1/sqrt(out_features) (= weight.size(1)).
    stdv = 1.0 / math.sqrt(out_features)
    weight = jax.random.uniform(
        kw, (in_features, out_features), jnp.float32, -stdv, stdv
    )
    bias = jax.random.uniform(kb, (out_features,), jnp.float32, -stdv, stdv)

    x = jax.random.normal(kx, (M, in_features), jnp.float32)

    out = linear(x, weight, bias)
    jax.block_until_ready(out)

    # Correctness check against plain JAX reference.
    ref = x @ weight + bias
    assert out.shape == (M, out_features)
    assert jnp.allclose(out, ref, atol=1e-4, rtol=1e-4)

    # Also exercise the multi-K-step accumulator path on a larger shape.
    M2, K2, N2 = 384, 1536, 512
    k2x, k2w, k2b = jax.random.split(jax.random.PRNGKey(1), 3)
    x2 = jax.random.normal(k2x, (M2, K2), jnp.float32)
    w2 = jax.random.uniform(k2w, (K2, N2), jnp.float32, -stdv, stdv)
    b2 = jax.random.uniform(k2b, (N2,), jnp.float32, -stdv, stdv)
    out2 = linear(x2, w2, b2, tk=512)
    jax.block_until_ready(out2)
    ref2 = x2 @ w2 + b2
    assert jnp.allclose(out2, ref2, atol=5e-4, rtol=5e-4)

    print("KERNEL_OK")
</pallas_src>

<mosaic_0001>
module attributes {stable_mosaic.version = 11 : i64} {
  func.func @_linear_kernel_single(%arg0: i32, %arg1: i32, %arg2: memref<32x128xf32, #tpu.memory_space<vmem>>, %arg3: memref<128x128xf32, #tpu.memory_space<vmem>>, %arg4: memref<1x128xf32, #tpu.memory_space<vmem>>, %arg5: memref<32x128xf32, #tpu.memory_space<vmem>>) attributes {dimension_semantics = [#tpu.dimension_semantics<parallel>, #tpu.dimension_semantics<parallel>], iteration_bounds = array<i64: 2, 1>, scalar_prefetch = 0 : i64, scratch_operands = 0 : i64, tpu.core_type = #tpu.core_type<tc>, window_params = [{transform_indices = @transform_0, window_bounds = array<i64: 32, 128>}, {transform_indices = @transform_1, window_bounds = array<i64: 128, 128>}, {transform_indices = @transform_2, window_bounds = array<i64: 1, 128>}, {transform_indices = @transform_3, window_bounds = array<i64: 32, 128>}]} {
    %c0 = arith.constant 0 : index
    %c0_0 = arith.constant 0 : index
    %0 = vector.load %arg2[%c0, %c0_0] : memref<32x128xf32, #tpu.memory_space<vmem>>, vector<32x128xf32>
    %c0_1 = arith.constant 0 : index
    %c0_2 = arith.constant 0 : index
    %1 = vector.load %arg3[%c0_1, %c0_2] : memref<128x128xf32, #tpu.memory_space<vmem>>, vector<128x128xf32>
    %cst = arith.constant dense<0.000000e+00> : vector<32x128xf32>
    %2 = tpu.matmul %0, %1, %cst {dimension_numbers = #tpu.dot_dimension_numbers<[1], [0], [0], [1], [0, 0, 1, 1], [], []>} : vector<32x128xf32>, vector<128x128xf32>, vector<32x128xf32> -> vector<32x128xf32>
    %c0_3 = arith.constant 0 : index
    %c0_4 = arith.constant 0 : index
    %3 = vector.load %arg4[%c0_3, %c0_4] : memref<1x128xf32, #tpu.memory_space<vmem>>, vector<1x128xf32>
    %4 = vector.broadcast %3 : vector<1x128xf32> to vector<32x128xf32>
    %5 = arith.addf %2, %4 : vector<32x128xf32>
    %c0_5 = arith.constant 0 : index
    %c0_6 = arith.constant 0 : index
    %6 = vector.load %arg5[%c0_5, %c0_6] : memref<32x128xf32, #tpu.memory_space<vmem>>, vector<32x128xf32>
    tpu.vector_store %arg5[%c0_5, %c0_6], %5 {strides = array<i32>} : memref<32x128xf32, #tpu.memory_space<vmem>>, vector<32x128xf32>,
    return
  }
  func.func @transform_0(%arg0: i32, %arg1: i32) -> (i32, i32) {
    %c0_i32 = arith.constant 0 : i32
    %c0_i32_0 = arith.constant 0 : i32
    return %arg0, %c0_i32 : i32, i32
  }
  func.func @transform_1(%arg0: i32, %arg1: i32) -> (i32, i32) {
    %c0_i32 = arith.constant 0 : i32
    %c0_i32_0 = arith.constant 0 : i32
    return %c0_i32, %arg1 : i32, i32
  }
  func.func @transform_2(%arg0: i32, %arg1: i32) -> (i32, i32) {
    %c0_i32 = arith.constant 0 : i32
    %c0_i32_0 = arith.constant 0 : i32
    return %c0_i32, %arg1 : i32, i32
  }
  func.func @transform_3(%arg0: i32, %arg1: i32) -> (i32, i32) {
    %c0_i32 = arith.constant 0 : i32
    return %arg0, %arg1 : i32, i32
  }
}

</mosaic_0001>

<bundles_post_ra>
// kernel: tpu_custom_call.1
= control target key start
LH: loop header
LB: loop body
LE: loop exit
PB: predicated region body
PF: predicated region fallthrough
CT: control target
= control target key end

     0   :  { %s913_s0 = inlined_call_operand.hbm [shape: f32[64,128], index: 0, kind: input, shape index: {}]   ;;  %s914_s1 = inlined_call_operand.hbm [shape: f32[128,128], index: 1, kind: input, shape index: {}]   ;;  %s915_s2 = inlined_call_operand.vmem [shape: f32[1,128], index: 2, kind: input, shape index: {}]   ;;  %s916_s3 = inlined_call_operand.hbm [shape: f32[64,128], index: 3, kind: output, shape index: {}]  }
   0x1   :  { %918 = sst [smem:[#allocation11_spill]] %s914_s1 }
   0x2   :  { %8 = vsyncpa [#allocation3], 0 }
   0x3   :  { %10 = vsyncpa [#allocation3 + $0x1], 0 }
   0x4   :  { %11 = vsyncpa [#allocation6], 0 }
   0x5   :  { %12 = vsyncpa [#allocation4], 0 }
   0x6   :  { %14 = vsyncpa [#allocation4 + $0x1], 0  ;;  %s745_s12 = smov 0   ;;  %s747_s13 = smov 0  }
   0x7   :  { %s749_s14 = smov 0   ;;  %s751_s15 = smov 0  }
   0x8   :  { %s753_s16 = smov 0   ;;  %s755_s17 = smov 0  }
   0x9 LB: > { %s426_s18 = sadd.s32 4294967295, %s718_s17   ;;  %s427_s19 = sadd.s32 4294967294, %s718_s17   ;;  %s718_s17 = sphi %s755_s17, %s20_s17   ;;  %s714_s16 = sphi %s753_s16, %s932_s16   ;;  %s710_s15 = sphi %s751_s15, %s931_s15   ;;  %s706_s14 = sphi %s749_s14, %s930_s14   ;;  %s702_s13 = sphi %s747_s13, %s929_s13   ;;  %s698_s12 = sphi %s745_s12, %s928_s12  }
   0xa   : > { %p52_p0 = scmp.ne.s32.totalorder %s702_s13, %s698_s12  ;;  %p779_p1 = scmp.eq.s32.totalorder %s426_s18, 0 }
   0xb   : > { %p783_p2 = scmp.eq.s32.totalorder %s426_s18, 1  ;;  %p136_p3 = scmp.eq.s32.totalorder %s427_s19, 1 }
   0xc   : > { %p789_p4 = por %p779_p1, %p52_p0  ;;  %p428_p5 = scmp.ge.s32.totalorder %s718_s17, 1 }
   0xd   : > { %p794_p6 = por %p136_p3, %p52_p0  ;;  %p143_p7 = scmp.lt.s32.totalorder %s718_s17, 3 }
   0xe   : > { %s923_s1 = sld [smem:[#allocation11_spill]]  ;;  %s720_s28 = smov [#allocation5]  }
   0xf   : > { %p802_p8 = pnand %p428_p5, %p143_p7  ;;  %s158_s29 = sshll.u32 %s720_s28, 4  ;;  %s159_s29 = int_to_ptr.vmem [resolvable:$true] %s158_s29 }
  0x10   : > { %p431_p11 = scmp.ge.s32.totalorder %s718_s17, 2  ;;  %s917_s30 = smov 128  }
  0x11   : > { %p502_p9 = pneg %p802_p8  ;;  %s722_s4 = smov 8  }
  0x12   : > { %s32_s5 = sadd.s32 1, %s714_s16  ;;  %s39_s6 = sadd.s32 1, %s706_s14 }
  0x13   : > { %p503_p10 = pnand %p502_p9, %p779_p1  ;;  %p34_p12 = scmp.ge.s32.totalorder %s32_s5, 2 }
  0x14   : > { %s156_s26 = sshll.u32 %s923_s1, 4  ;;  %p46_p13 = scmp.ne.s32.totalorder %s706_s14, %s702_s13  ;;  %s157_s26 = int_to_ptr.hbm [resolvable:$true] %s156_s26 }
  0x15   : > { %505 = dma.hbm_to_vmem [thread:$0]  (!%p503_p10), %s157_s26, 2048, %s159_s29, [#allocation6], %s917_s30, %s917_s30, %s722_s4  }
  0x16   : > { %p47_p0 = scmp.eq.s32.totalorder %s718_s17, 0  ;;  %s934_s5 = smov (%p34_p12, %s32_s5), 0 }
  0x17   : > { %p827_p5 = por %p783_p2, %p46_p13  ;;  %s36_s9 = ssub.s32 %s714_s16, %s934_s5 }
  0x18   : > { %p821_p3 = por %p47_p0, %p46_p13  ;;  %p515_p7 = scmp.lt.s32.totalorder %s718_s17, 2 }
  0x19   : > { %p37_p9 = scmp.eq.s32.totalorder %s36_s9, 0  ;;  %s178_s10 = sand.u32 1, %s706_s14  }
  0x1a   : > { %s432_s11 = sshll.u32 %s178_s10, 5  ;;  %s444_s19 = sshll.u32 %s714_s16, 5 }
  0x1b   : > { %s836_s18 = scalar_select %p37_p9, %s706_s14, %s39_s6  }
  0x1c   : > { %s187_s26 = scalar_lea.hbm %s913_s0, %s444_s19  ;;  %s182_s28 = scalar_lea.vmem [#allocation2], %s432_s11 }
  0x1d   : > { %s190_s29 = sshll.u32 %s182_s28, 4  ;;  %s188_s21 = sshll.u32 %s187_s26, 4  ;;  %s191_s29 = int_to_ptr.vmem [resolvable:$true] %s190_s29  ;;  %s189_s21 = int_to_ptr.hbm [resolvable:$true] %s188_s21 }
  0x1e   : > { %p507_p2 = pnand %p515_p7, %p821_p3  ;;  %s179_s30 = scalar_lea.sflag [#allocation3], %s178_s10 }
  0x1f   : > { %s927_s1 = smov 128   ;;  %202 = sbr.rel (%p802_p8) target bundleno = 210 (0xd2), region = 32 }
  0x20   : > { %509 = dma.hbm_to_vmem [thread:$0]  (!%p507_p2), %s189_s21, 512, %s191_s29, %s179_s30, %s927_s1, %s927_s1, %s722_s4  }
  0x21   : > { %s850_s6 = sand.u32 (!%p802_p8), 1, %s702_s13  }
  0x22   : > { %s436_s9 = sshll.u32 (!%p802_p8), %s850_s6, 5  ;;  %s205_s11 = scalar_lea.sflag (!%p802_p8), [#allocation3], %s850_s6 }
  0x23   : > { %s856_s7 = scalar_lea.vmem (!%p802_p8), [#allocation2], %s436_s9 }
  0x24   : > { %685 = dma.done.wait (%p789_p4), %s205_s11, 512  }
  0x25   : > { %687 = vsyncadd (%p789_p4), %s205_s11, 4294966784 }
  0x26   : > { %689 = dma.done.wait (%p779_p1), [#allocation6], 2048  }
  0x27   : > { %691 = vsyncadd (%p779_p1), [#allocation6], 4294965248  ;;  %v264_v0 = vld [vmem:[#allocation5 + $0x78] sm:$0xff]  ;;  %v263_v1 = vld [vmem:[#allocation5 + $0x70] sm:$0xff]  ;;  %s445_s1 = sshll.u32 %s710_s15, 5  ;;  %s239_s10 = scalar_lea.vmem [#allocation7], %s436_s9 }
  0x28   : > { %447 = vmatpush.msra.mxu2 %v264_v0  ;;  %448 = vmatpush.msra.mxu3 %v264_v0  ;;  %v262_v2 = vld [vmem:[#allocation5 + $0x68] sm:$0xff]  ;;  %v261_v3 = vld [vmem:[#allocation5 + $0x60] sm:$0xff]  ;;  %v260_v4 = vld [vmem:[#allocation5 + $0x58] sm:$0xff]  ;;  %s315_s4 = scalar_lea.hbm %s916_s3, %s445_s1  ;;  %s316_s19 = sshll.u32 %s239_s10, 4  ;;  %s317_s19 = int_to_ptr.vmem [resolvable:$true] %s316_s19 }
  0x29   : > { %269 = vmatpush.msra.mxu0 %v264_v0  ;;  %446 = vmatpush.msra.mxu1 %v264_v0  ;;  %v259_v5 = vld [vmem:[#allocation5 + $0x50] sm:$0xff]  ;;  %v258_v6 = vld [vmem:[#allocation5 + $0x48] sm:$0xff]  ;;  %v257_v7 = vld [vmem:[#allocation5 + $0x40] sm:$0xff]  ;;  %s318_s24 = sshll.u32 %s315_s4, 4  ;;  %s303_s15 = scalar_lea.sflag [#allocation4], %s850_s6  ;;  %s319_s24 = int_to_ptr.hbm [resolvable:$true] %s318_s24 }
  0x2a   : > { %450 = vmatpush.msra.mxu2 %v263_v1  ;;  %451 = vmatpush.msra.mxu3 %v263_v1  ;;  %v256_v8 = vld [vmem:[#allocation5 + $0x38] sm:$0xff]  ;;  %v255_v9 = vld [vmem:[#allocation5 + $0x30] sm:$0xff]  ;;  %v254_v10 = vld [vmem:[#allocation5 + $0x28] sm:$0xff]  ;;  %s646_s25 = sshra.s32 %s319_s24, 4  ;;  %s652_s21 = scalar_lea.hbm %s916_s3, 64  ;;  %s647_s25 = int_to_ptr.hbm [resolvable:$true] %s646_s25 }
  0x2b   : > { %270 = vmatpush.msra.mxu0 %v263_v1  ;;  %449 = vmatpush.msra.mxu1 %v263_v1  ;;  %v253_v11 = vld [vmem:[#allocation5 + $0x20] sm:$0xff]  ;;  %v252_v12 = vld [vmem:[#allocation5 + $0x18] sm:$0xff]  ;;  %v251_v13 = vld [vmem:[#allocation5 + $0x10] sm:$0xff]  ;;  %s648_s26 = scalar_lea.hbm %s647_s25, 32  ;;  %p653_p10 = scmp.lt.s32.totalorder %s647_s25, %s916_s3 }
  0x2c   : > { %453 = vmatpush.msra.mxu2 %v262_v2  ;;  %454 = vmatpush.msra.mxu3 %v262_v2  ;;  %v250_v14 = vld [vmem:[#allocation5 + $0x8] sm:$0xff]  ;;  %v249_v15 = vld [vmem:[#allocation5] sm:$0xff]  ;;  %v247_v16 = vld [vmem:[%s856_s7 + $0x10] sm:$0xff]  ;;  %p649_p1 = scmp.ne.s32.totalorder %s647_s25, %s648_s26  ;;  %p654_p12 = scmp.lt.s32.totalorder %s652_s21, %s648_s26 }
  0x2d   : > { %271 = vmatpush.msra.mxu0 %v262_v2  ;;  %452 = vmatpush.msra.mxu1 %v262_v2  ;;  %v248_v17 = vld [vmem:[%s856_s7 + $0x18] sm:$0xff]  ;;  %v245_v18 = vld [vmem:[%s856_s7] sm:$0xff]  ;;  %v246_v19 = vld [vmem:[%s856_s7 + $0x8] sm:$0xff] }
  0x2e   : > { %456 = vmatpush.msra.mxu2 %v261_v3  ;;  %457 = vmatpush.msra.mxu3 %v261_v3  ;;  %v571_v20 = vld [vmem:[%s915_s2] ss:$0 sm:$0xff]  ;;  %p650_p4 = pnand %p649_p1, %p827_p5  ;;  %p655_p13 = por %p654_p12, %p653_p10 }
  0x2f   : > { %272 = vmatpush.msra.mxu0 %v261_v3  ;;  %455 = vmatpush.msra.mxu1 %v261_v3 }
  0x30   : > { %459 = vmatpush.msra.mxu2 %v260_v4  ;;  %460 = vmatpush.msra.mxu3 %v260_v4  ;;  %p651_p8 = pneg %p650_p4 }
  0x31   : > { %273 = vmatpush.msra.mxu0 %v260_v4  ;;  %458 = vmatpush.msra.mxu1 %v260_v4 }
  0x32   : > { %462 = vmatpush.msra.mxu2 %v259_v5  ;;  %463 = vmatpush.msra.mxu3 %v259_v5  ;;  %p656_p0 = pnand %p655_p13, %p651_p8 }
  0x33   : > { %274 = vmatpush.msra.mxu0 %v259_v5  ;;  %461 = vmatpush.msra.mxu1 %v259_v5 }
  0x34   : > { %465 = vmatpush.msra.mxu2 %v258_v6  ;;  %466 = vmatpush.msra.mxu3 %v258_v6 }
  0x35   : > { %275 = vmatpush.msra.mxu0 %v258_v6  ;;  %464 = vmatpush.msra.mxu1 %v258_v6 }
  0x36   : > { %468 = vmatpush.msra.mxu2 %v257_v7  ;;  %469 = vmatpush.msra.mxu3 %v257_v7 }
  0x37   : > { %276 = vmatpush.msra.mxu0 %v257_v7  ;;  %467 = vmatpush.msra.mxu1 %v257_v7 }
  0x38   : > { %471 = vmatpush.msra.mxu2 %v256_v8  ;;  %472 = vmatpush.msra.mxu3 %v256_v8 }
  0x39   : > { %277 = vmatpush.msra.mxu0 %v256_v8  ;;  %470 = vmatpush.msra.mxu1 %v256_v8 }
  0x3a   : > { %474 = vmatpush.msra.mxu2 %v255_v9  ;;  %475 = vmatpush.msra.mxu3 %v255_v9 }
  0x3b   : > { %278 = vmatpush.msra.mxu0 %v255_v9  ;;  %473 = vmatpush.msra.mxu1 %v255_v9 }
  0x3c   : > { %477 = vmatpush.msra.mxu2 %v254_v10  ;;  %478 = vmatpush.msra.mxu3 %v254_v10 }
  0x3d   : > { %279 = vmatpush.msra.mxu0 %v254_v10  ;;  %476 = vmatpush.msra.mxu1 %v254_v10 }
  0x3e   : > { %480 = vmatpush.msra.mxu2 %v253_v11  ;;  %481 = vmatpush.msra.mxu3 %v253_v11 }
  0x3f   : > { %280 = vmatpush.msra.mxu0 %v253_v11  ;;  %479 = vmatpush.msra.mxu1 %v253_v11 }
  0x40   : > { %483 = vmatpush.msra.mxu2 %v252_v12  ;;  %484 = vmatpush.msra.mxu3 %v252_v12 }
  0x41   : > { %281 = vmatpush.msra.mxu0 %v252_v12  ;;  %482 = vmatpush.msra.mxu1 %v252_v12 }
  0x42   : > { %486 = vmatpush.msra.mxu2 %v251_v13  ;;  %487 = vmatpush.msra.mxu3 %v251_v13 }
  0x43   : > { %282 = vmatpush.msra.mxu0 %v251_v13  ;;  %485 = vmatpush.msra.mxu1 %v251_v13 }
  0x44   : > { %489 = vmatpush.msra.mxu2 %v250_v14  ;;  %490 = vmatpush.msra.mxu3 %v250_v14 }
  0x45   : > { %283 = vmatpush.msra.mxu0 %v250_v14  ;;  %488 = vmatpush.msra.mxu1 %v250_v14 }
  0x46   : > { %492 = vmatpush.msra.mxu2 %v249_v15  ;;  %493 = vmatpush.msra.mxu3 %v249_v15 }
  0x47   : > { %291 = vmatmul.f32.vlgmr.msra.gmra.mxu2 %v247_v16  ;;  %294 = vmatmul.f32.vlgmr.msra.gmra.mxu3 %v248_v17 }
  0x48   : > { %284 = vmatpush.msra.mxu0 %v249_v15  ;;  %491 = vmatpush.msra.mxu1 %v249_v15 }
  0x49   : > { %285 = vmatmul.f32.vlgmr.msra.gmra.mxu0 %v245_v18  ;;  %288 = vmatmul.f32.vlgmr.msra.gmra.mxu1 %v246_v19 }
  0xc6   : > { %v286_v21 = vpop.f32.mrf.mxu0  ;;  %v289_v22 = vpop.f32.mrf.mxu1 }
  0xc7   : > { %v287_v23 = vadd.f32 %v571_v20, %v286_v21  ;;  %v290_v24 = vadd.f32 %v571_v20, %v289_v22 }
  0xc9   : > { %298 = vst [vmem:[%s239_s10] sm:$0xff] %v287_v23 }
  0xca   : > { %299 = vst [vmem:[%s239_s10 + $0x8] sm:$0xff] %v290_v24  ;;  %v292_v25 = vpop.f32.mrf.mxu2  ;;  %v295_v26 = vpop.f32.mrf.mxu3 }
  0xcb   : > { %v293_v27 = vadd.f32 %v571_v20, %v292_v25  ;;  %v296_v28 = vadd.f32 %v571_v20, %v295_v26 }
  0xcd   : > { %300 = vst [vmem:[%s239_s10 + $0x10] sm:$0xff] %v293_v27 }
  0xce   : > { %301 = vst [vmem:[%s239_s10 + $0x18] sm:$0xff] %v296_v28 }
  0xcf   : > { %659 = shalt.err (!%p656_p0)
}
  0xd0   : > { %s723_s6 = smov 128   ;;  %s724_s7 = smov 8  }
  0xd1   : > { %500 = dma.vmem_to_hbm [thread:$0]  (%p827_p5), %s317_s19, 512, %s319_s24, %s303_s15, %s723_s6, %s723_s6, %s724_s7  }
  0xd2 PF: > { %s333_s1 = sand.u32 1, %s698_s12   ;;  %p511_p3 = pnand %p431_p11, %p794_p6 }
  0xd3   : > { %s334_s20 = scalar_lea.sflag [#allocation4], %s333_s1 }
  0xd4   : > { %p512_p7 = pneg %p511_p3 }
  0xd6   : > { %693 = dma.done.wait (%p512_p7), %s334_s20, 512  }
  0xd7   : > { %695 = vsyncadd (%p512_p7), %s334_s20, 4294966784  ;;  %s20_s17 = sadd.s32 1, %s718_s17   ;;  %s928_s12 = smov %s702_s13 }
  0xd8   : > { %p17_p9 = scmp.ge.s32.totalorder %s20_s17, 4   ;;  %s929_s13 = smov %s706_s14 }
  0xd9   : > { %s930_s14 = smov %s836_s18  ;;  %s931_s15 = smov %s714_s16 }
  0xda   : > { %s932_s16 = smov %s934_s5  ;;  %19 = sbr.rel (!%p17_p9) target bundleno = 9 (0x9), region = 85 }
  0xdf   :  { %340 = vsyncpa [#allocation3], 1 }
  0xe0   :  { %342 = vsyncpa [#allocation3 + $0x1], 1 }
  0xe1   :  { %343 = vsyncpa [#allocation6], 1 }
  0xe2   :  { %344 = vsyncpa [#allocation4], 1 }
  0xe3   :  { %346 = vsyncpa [#allocation4 + $0x1], 1 }

</bundles_post_ra>
